<compile_context>
chip_gen: v7x
topology: tpu7x:2x2x1
jax: 0.10.0
libtpu: 0.0.40
codegen_flags: <defaults>
</compile_context>

<pallas_src>
import functools

import jax
import jax.numpy as jnp
from jax.experimental import pallas as pl
from jax.experimental.pallas import tpu as pltpu


def _simple_nn_kernel(xp_ref, w1_ref, b1_ref, w2_ref, b2_ref, o_ref):
    # xp: (TR, P*D)   w1: (P*D, P*H)   b1: (1, P*H)   w2: (P*H, P)
    # b2: (1,) in SMEM                 o:  (TR, P)
    #
    # fc1: lane-dense MXU matmul (K = P*D, N = P*H) + bias + ReLU (VPU).
    h = jnp.dot(xp_ref[...], w1_ref[...], preferred_element_type=jnp.float32)
    h = jnp.maximum(h + b1_ref[...], 0.0)

    # fc2: block-diagonal matmul keeps the batch on the sublane axis through the
    # store (no sublane->lane relayout).  b2 comes off the scalar path.
    z = jnp.dot(h, w2_ref[...], preferred_element_type=jnp.float32) + b2_ref[0]

    # Sigmoid on the EUP; plain 2-D store of the (TR, P) block.
    o_ref[...] = jax.nn.sigmoid(z).astype(o_ref.dtype)


@functools.partial(jax.jit, static_argnames=("block_rows", "pack"))
def simple_nn_forward(x, w1_t, b1, w2_t, b2, *, block_rows=512, pack=8):
    """Forward pass of SimpleNN: sigmoid(relu(x @ w1_t + b1) @ w2_t + b2).

    x:    (B, D) f32
    w1_t: (D, H)  -- fc1 weight pre-transposed from PyTorch's (H, D)
    b1:   (H,)
    w2_t: (H, 1)  -- fc2 weight pre-transposed from PyTorch's (1, H)
    b2:   (1,)
    block_rows: packed-row tile (each packed row holds `pack` batch rows).
    pack: rows packed into the lane/K dimension (8 for v6e/v7x, 4 fits v5e's
          128-wide MXU exactly; 8 is still correct there).
    Returns (B, 1) f32.
    """
    B, D = x.shape
    H = w1_t.shape[1]
    P = int(pack)

    xf = x.astype(jnp.float32)
    # Pad only to a multiple of the pack factor (<= P-1 rows); no pad at all in
    # the common B % P == 0 case.  Grid-tile padding is NOT done host-side: the
    # last grid tile may run partially OOB and Pallas masks those writes.
    Bp = ((B + P - 1) // P) * P
    if Bp != B:
        xf = jnp.pad(xf, ((0, Bp - B), (0, 0)))
    R = Bp // P
    # Free relayout: (Bp, D) row-major == (R, P*D) row-major.
    xp = xf.reshape(R, P * D)

    # Block-diagonal packed weights (tiny: (P*D, P*H) and (P*H, P)).
    w1f = w1_t.astype(jnp.float32)
    w2f = w2_t.reshape(H, 1).astype(jnp.float32)
    eyeP = jnp.eye(P, dtype=jnp.float32)
    # w1_bd[p*D + d, q*H + h] = (p == q) * w1_t[d, h]
    w1_bd = (eyeP[:, None, :, None] * w1f[None, :, None, :]).reshape(P * D, P * H)
    # b1_bd[0, p*H + h] = b1[h]
    b1_bd = jnp.tile(b1.astype(jnp.float32), P).reshape(1, P * H)
    # w2_bd[q*H + h, p] = (q == p) * w2_t[h, 0]
    w2_bd = (eyeP[:, None, :] * w2f[None, :, 0, None]).reshape(P * H, P)
    b2_vec = b2.reshape(1).astype(jnp.float32)

    # Row tiling over packed rows.  TR is a multiple of 8 (sublane aligned)
    # unless the whole array fits in a single full-extent tile.
    TR = int(block_rows)
    if R <= TR:
        TR = R
        num_tiles = 1
    else:
        num_tiles = pl.cdiv(R, TR)  # last tile may be partial (Pallas masks it)

    out_packed = pl.pallas_call(
        _simple_nn_kernel,
        out_shape=jax.ShapeDtypeStruct((R, P), jnp.float32),
        grid=(num_tiles,),
        in_specs=[
            pl.BlockSpec((TR, P * D), lambda i: (i, 0)),            # x: streamed tiles
            pl.BlockSpec((P * D, P * H), lambda i: (0, 0)),         # w1_bd: resident
            pl.BlockSpec((1, P * H), lambda i: (0, 0)),             # b1_bd: resident
            pl.BlockSpec((P * H, P), lambda i: (0, 0)),             # w2_bd: resident
            pl.BlockSpec(memory_space=pltpu.MemorySpace.SMEM),      # b2: scalar path
        ],
        out_specs=pl.BlockSpec((TR, P), lambda i: (i, 0)),          # batch stays on sublanes
        compiler_params=pltpu.CompilerParams(
            dimension_semantics=("parallel",),
            vmem_limit_bytes=32 * 1024 * 1024,
        ),
    )(xp, w1_bd, b1_bd, w2_bd, b2_vec)

    # (R, P) row-major == (Bp, 1) row-major; slice off the pad rows.
    return out_packed.reshape(Bp, 1)[:B]


if __name__ == "__main__":
    key = jax.random.PRNGKey(0)
    B, D, H = 1000, 32, 16

    k_x, k_w1, k_b1, k_w2, k_b2 = jax.random.split(key, 5)
    x = jax.random.normal(k_x, (B, D), dtype=jnp.float32)

    # Parameters stored pre-transposed: PyTorch fc weight is (out, in); we keep (in, out).
    w1_t = jax.random.normal(k_w1, (D, H), dtype=jnp.float32) * 0.1
    b1 = jax.random.normal(k_b1, (H,), dtype=jnp.float32) * 0.1
    w2_t = jax.random.normal(k_w2, (H, 1), dtype=jnp.float32) * 0.1
    b2 = jax.random.normal(k_b2, (1,), dtype=jnp.float32) * 0.1

    ref = jax.nn.sigmoid(jnp.maximum(x @ w1_t + b1, 0.0) @ w2_t + b2)

    # Small row tile -> 2 grid tiles with a partial last tile (exercises the
    # no-host-pad / OOB-masking path).
    out = simple_nn_forward(x, w1_t, b1, w2_t, b2, block_rows=64)
    out = jax.block_until_ready(out)
    assert out.shape == (B, 1)
    assert jnp.allclose(out, ref, atol=1e-5, rtol=1e-5), float(jnp.max(jnp.abs(out - ref)))

    # Odd batch (not a multiple of the pack factor) -> tiny pad-to-8 path,
    # single full-extent tile with the default (large) block_rows.
    B2 = 37
    out2 = jax.block_until_ready(simple_nn_forward(x[:B2], w1_t, b1, w2_t, b2))
    assert out2.shape == (B2, 1)
    assert jnp.allclose(out2, ref[:B2], atol=1e-5, rtol=1e-5)

    print("KERNEL_OK")
</pallas_src>

<mosaic_0001>
module attributes {stable_mosaic.version = 11 : i64} {
  func.func @_simple_nn_kernel(%arg0: i32, %arg1: memref<64x256xf32, #tpu.memory_space<vmem>>, %arg2: memref<256x128xf32, #tpu.memory_space<vmem>>, %arg3: memref<1x128xf32, #tpu.memory_space<vmem>>, %arg4: memref<128x8xf32, #tpu.memory_space<vmem>>, %arg5: memref<1xf32, #tpu.memory_space<smem>>, %arg6: memref<64x8xf32, #tpu.memory_space<vmem>>) attributes {dimension_semantics = [#tpu.dimension_semantics<parallel>], iteration_bounds = array<i64: 2>, scalar_prefetch = 0 : i64, scratch_operands = 0 : i64, tpu.core_type = #tpu.core_type<tc>, window_params = [{transform_indices = @transform_0, window_bounds = array<i64: 64, 256>}, {pipeline_mode = #tpu.pipeline_mode<synchronous>, transform_indices = @transform_1, window_bounds = array<i64: 256, 128>}, {pipeline_mode = #tpu.pipeline_mode<synchronous>, transform_indices = @transform_2, window_bounds = array<i64: 1, 128>}, {pipeline_mode = #tpu.pipeline_mode<synchronous>, transform_indices = @transform_3, window_bounds = array<i64: 128, 8>}, {transform_indices = @transform_4, window_bounds = array<i64: 1>}, {transform_indices = @transform_5, window_bounds = array<i64: 64, 8>}]} {
    %c0 = arith.constant 0 : index
    %c0_0 = arith.constant 0 : index
    %0 = vector.load %arg1[%c0, %c0_0] : memref<64x256xf32, #tpu.memory_space<vmem>>, vector<64x256xf32>
    %c0_1 = arith.constant 0 : index
    %c0_2 = arith.constant 0 : index
    %1 = vector.load %arg2[%c0_1, %c0_2] : memref<256x128xf32, #tpu.memory_space<vmem>>, vector<256x128xf32>
    %cst = arith.constant dense<0.000000e+00> : vector<64x128xf32>
    %2 = tpu.matmul %0, %1, %cst {dimension_numbers = #tpu.dot_dimension_numbers<[1], [0], [0], [1], [0, 0, 1, 1], [], []>} : vector<64x256xf32>, vector<256x128xf32>, vector<64x128xf32> -> vector<64x128xf32>
    %c0_3 = arith.constant 0 : index
    %c0_4 = arith.constant 0 : index
    %3 = vector.load %arg3[%c0_3, %c0_4] : memref<1x128xf32, #tpu.memory_space<vmem>>, vector<1x128xf32>
    %4 = vector.broadcast %3 : vector<1x128xf32> to vector<64x128xf32>
    %5 = arith.addf %2, %4 : vector<64x128xf32>
    %cst_5 = arith.constant 0.000000e+00 : f32
    %6 = vector.broadcast %cst_5 : f32 to vector<64x128xf32>
    %7 = arith.maximumf %5, %6 : vector<64x128xf32>
    %c0_6 = arith.constant 0 : index
    %c0_7 = arith.constant 0 : index
    %8 = vector.load %arg4[%c0_6, %c0_7] : memref<128x8xf32, #tpu.memory_space<vmem>>, vector<128x8xf32>
    %cst_8 = arith.constant dense<0.000000e+00> : vector<64x8xf32>
    %9 = tpu.matmul %7, %8, %cst_8 {dimension_numbers = #tpu.dot_dimension_numbers<[1], [0], [0], [1], [0, 0, 1, 1], [], []>} : vector<64x128xf32>, vector<128x8xf32>, vector<64x8xf32> -> vector<64x8xf32>
    %c0_9 = arith.constant 0 : index
    %10 = memref.load %arg5[%c0_9] : memref<1xf32, #tpu.memory_space<smem>>
    %11 = vector.broadcast %10 : f32 to vector<64x8xf32>
    %12 = arith.addf %9, %11 : vector<64x8xf32>
    %13 = arith.negf %12 : vector<64x8xf32>
    %14 = math.exp %13 : vector<64x8xf32>
    %cst_10 = arith.constant 1.000000e+00 : f32
    %15 = vector.broadcast %cst_10 : f32 to vector<64x8xf32>
    %16 = arith.addf %15, %14 : vector<64x8xf32>
    %17 = arith.divf %15, %16 : vector<64x8xf32>
    %c0_11 = arith.constant 0 : index
    %c0_12 = arith.constant 0 : index
    %18 = vector.load %arg6[%c0_11, %c0_12] : memref<64x8xf32, #tpu.memory_space<vmem>>, vector<64x8xf32>
    tpu.vector_store %arg6[%c0_11, %c0_12], %17 {strides = array<i32>} : memref<64x8xf32, #tpu.memory_space<vmem>>, vector<64x8xf32>,
    return
  }
  func.func @transform_0(%arg0: i32) -> (i32, i32) {
    %c0_i32 = arith.constant 0 : i32
    %c0_i32_0 = arith.constant 0 : i32
    return %arg0, %c0_i32 : i32, i32
  }
  func.func @transform_1(%arg0: i32) -> (i32, i32) {
    %c0_i32 = arith.constant 0 : i32
    %c0_i32_0 = arith.constant 0 : i32
    %c0_i32_1 = arith.constant 0 : i32
    return %c0_i32, %c0_i32_0 : i32, i32
  }
  func.func @transform_2(%arg0: i32) -> (i32, i32) {
    %c0_i32 = arith.constant 0 : i32
    %c0_i32_0 = arith.constant 0 : i32
    %c0_i32_1 = arith.constant 0 : i32
    return %c0_i32, %c0_i32_0 : i32, i32
  }
  func.func @transform_3(%arg0: i32) -> (i32, i32) {
    %c0_i32 = arith.constant 0 : i32
    %c0_i32_0 = arith.constant 0 : i32
    %c0_i32_1 = arith.constant 0 : i32
    return %c0_i32, %c0_i32_0 : i32, i32
  }
  func.func @transform_4(%arg0: i32) -> i32 {
    %c0_i32 = arith.constant 0 : i32
    %c0_i32_0 = arith.constant 0 : i32
    return %c0_i32 : i32
  }
  func.func @transform_5(%arg0: i32) -> (i32, i32) {
    %c0_i32 = arith.constant 0 : i32
    %c0_i32_0 = arith.constant 0 : i32
    return %arg0, %c0_i32 : i32, i32
  }
}

</mosaic_0001>

<bundles_post_ra>
// kernel: tile.8
= control target key start
LH: loop header
LB: loop body
LE: loop exit
PB: predicated region body
PF: predicated region fallthrough
CT: control target
= control target key end

     0   :  { %s22_s0 = inlined_call_operand.vmem [shape: f32[16], index: 0, kind: input, shape index: {}]   ;;  %s23_s1 = inlined_call_operand.vmem [shape: f32[8,16], index: 1, kind: output, shape index: {}]  }
   0x1   :  { %v4_v0 = vld [vmem:[%s22_s0] ss:$0 sm:$0xff] }
   0x2   :  { %5 = vst [vmem:[%s23_s1] sm:$0xff] %v4_v0 }

// kernel: tile.9
= control target key start
LH: loop header
LB: loop body
LE: loop exit
PB: predicated region body
PF: predicated region fallthrough
CT: control target
= control target key end

     0   :  { %s67_s10 = smov 112   ;;  %s68_s11 = smov 80   ;;  %vm3_vm0 = vcmask 130048   ;;  %vm9_vm1 = vcmask 1048448   ;;  %vm15_vm2 = vcmask 917248   ;;  %vm21_vm3 = vcmask 786048   ;;  %s111_s0 = inlined_call_operand.vmem [shape: f32[8,16], index: 0, kind: input, shape index: {}]   ;;  %s112_s1 = inlined_call_operand.vmem [shape: f32[1,128], index: 1, kind: output, shape index: {}]  }
   0x1   :  { %v53_v0 = vld [vmem:[%s111_s0 + $0x7] sm:$0x1]   ;;  %v55_v1 = vld [vmem:[%s111_s0 + $0x5] sm:$0x1]   ;;  %v54_v2 = vld [vmem:[%s111_s0 + $0x6] sm:$0x1]  }
   0x2   :  { %7 = vrot.lane.b32.xlu0 %v53_v0, %s67_s10  ;;  %19 = vrot.lane.b32.xlu1 %v55_v1, %s68_s11  ;;  %v56_v3 = vld [vmem:[%s111_s0 + $0x4] sm:$0x1]   ;;  %v2_v4 = vld [vmem:[%s111_s0] sm:$0x1]   ;;  %s69_s18 = smov 96   ;;  %s70_s19 = smov 64  }
   0x3   :  { %4 = vst.msk [vmem:[#allocation0] sm:$0x1] %vm3_vm0, %v2_v4   ;;  %v57_v5 = vld [vmem:[%s111_s0 + $0x3] sm:$0x1]   ;;  %v58_v6 = vld [vmem:[%s111_s0 + $0x2] sm:$0x1]  }
   0x4   :  { %s71_s24 = smov 48   ;;  %s72_s25 = smov 32   ;;  %v59_v7 = vld [vmem:[%s111_s0 + $0x1] sm:$0x1]   ;;  %vm27_vm4 = vcmask 654848   ;;  %vm33_vm5 = vcmask 523648  }
   0x5   :  { %s73_s0 = smov 16   ;;  %vm39_vm6 = vcmask 392448   ;;  %vm45_vm7 = vcmask 261248  }
   0x6   :  { %13 = vrot.lane.b32.xlu0 %v54_v2, %s69_s18  ;;  %25 = vrot.lane.b32.xlu1 %v56_v3, %s70_s19 }
   0xa   :  { %31 = vrot.lane.b32.xlu0 %v57_v5, %s71_s24  ;;  %37 = vrot.lane.b32.xlu1 %v58_v6, %s72_s25 }
   0xe   :  { %43 = vrot.lane.b32.xlu0 %v59_v7, %s73_s0 }
  0x74   :  { %v8_v8 = vpop.permute.xlu0 %7   ;;  %v20_v9 = vpop.permute.xlu1 %19  }
  0x75   :  { %10 = vst.msk [vmem:[#allocation0] sm:$0x1] %vm9_vm1, %v8_v8  }
  0x78   :  { %v14_v10 = vpop.permute.xlu0 %13   ;;  %v26_v11 = vpop.permute.xlu1 %25  }
  0x79   :  { %16 = vst.msk [vmem:[#allocation0] sm:$0x1] %vm15_vm2, %v14_v10  }
  0x7a   :  { %22 = vst.msk [vmem:[#allocation0] sm:$0x1] %vm21_vm3, %v20_v9  }
  0x7b   :  { %28 = vst.msk [vmem:[#allocation0] sm:$0x1] %vm27_vm4, %v26_v11  }
  0x7c   :  { %v32_v12 = vpop.permute.xlu0 %31   ;;  %v38_v13 = vpop.permute.xlu1 %37  }
  0x7d   :  { %34 = vst.msk [vmem:[#allocation0] sm:$0x1] %vm33_vm5, %v32_v12  }
  0x7e   :  { %40 = vst.msk [vmem:[#allocation0] sm:$0x1] %vm39_vm6, %v38_v13  }
  0x80   :  { %v44_v14 = vpop.permute.xlu0 %43  }
  0x81   :  { %46 = vst.msk [vmem:[#allocation0] sm:$0x1] %vm45_vm7, %v44_v14  }
  0x88   :  { %v50_v15 = vld [vmem:[#allocation0] sm:$0x1] }
  0x89   :  { %52 = vst [vmem:[%s112_s1] sm:$0x1] %v50_v15 }

// kernel: simple_nn_forward.1
= control target key start
LH: loop header
LB: loop body
LE: loop exit
PB: predicated region body
PF: predicated region fallthrough
CT: control target
= control target key end

     0   :  { %s927_s20 = smov 0   ;;  %s1131_s0 = inlined_call_operand.vmem [shape: f32[125,256], index: 0, kind: input, shape index: {}]   ;;  %s1132_s1 = inlined_call_operand.vmem [shape: f32[256,128], index: 1, kind: input, shape index: {}]   ;;  %s1133_s2 = inlined_call_operand.vmem [shape: f32[1,128], index: 2, kind: input, shape index: {}]   ;;  %s1134_s3 = inlined_call_operand.vmem [shape: f32[128,8], index: 3, kind: input, shape index: {}]   ;;  %s1135_s4 = inlined_call_operand.<no memory space> [shape: f32[1], index: 4, kind: input, shape index: {}]   ;;  %s1136_s5 = inlined_call_operand.vmem [shape: f32[125,8], index: 5, kind: output, shape index: {}]  }
   0x1   :  { %10 = sst [smem:[#allocation2]] %s1135_s4 }
   0x2 LB: > { %s636_s21 = sadd.s32 4294967295, %s892_s20   ;;  %p640_p0 = scmp.ge.s32.totalorder %s892_s20, 1  ;;  %s892_s20 = sphi %s927_s20, %s16_s20  }
   0x3   : > { %p190_p1 = scmp.lt.s32.totalorder %s892_s20, 3 }
   0x5   : > { %p191_p2 = pnand %p640_p0, %p190_p1 }
   0x6   : > { %v264_v0 = vld [vmem:[%s1132_s1 + $0x80] sm:$0xff] (!%p191_p2)  ;;  %v265_v1 = vld [vmem:[%s1132_s1 + $0x88] sm:$0xff] (!%p191_p2)  ;;  %s641_s27 = sshll.u32 (!%p191_p2), %s636_s21, 3  ;;  %v266_v5 = vld [vmem:[%s1132_s1 + $0x90] sm:$0xff] (!%p191_p2)  ;;  %s416_s30 = sld [smem:[#allocation2]] (!%p191_p2)  ;;  %vm571_vm0 = vcmask (!%p191_p2), 64512  }
   0x7   : > { %194 = sbr.rel (%p191_p2) target bundleno = 530 (0x212), region = 40  ;;  %v248_v2 = vld [vmem:[%s1132_s1] sm:$0xff] (!%p191_p2)  ;;  %v782_v3 = vpack.c.bf16 (!%p191_p2), %v265_v1, %v264_v0  ;;  %v249_v4 = vld [vmem:[%s1132_s1 + $0x8] sm:$0xff] (!%p191_p2)  ;;  %v267_v6 = vld [vmem:[%s1132_s1 + $0x98] sm:$0xff] (!%p191_p2)  ;;  %p220_p3 = scmp.lt.s32.totalorder (!%p191_p2), %s641_s27, 15 }
   0x8   : > { %v784_v7 = vpack.c.bf16 (!%p191_p2), %v249_v4, %v248_v2  ;;  %v786_v8 = vpack.c.bf16 (!%p191_p2), %v267_v6, %v266_v5  ;;  %v250_v9 = vld [vmem:[%s1132_s1 + $0x10] sm:$0xff] (!%p191_p2)  ;;  %v251_v10 = vld [vmem:[%s1132_s1 + $0x18] sm:$0xff] (!%p191_p2)  ;;  %v268_v11 = vld [vmem:[%s1132_s1 + $0xa0] sm:$0xff] (!%p191_p2) }
   0x9   : > { %783 = vmatprep.subr.bf16.mxu0 (!%p191_p2), %v782_v3  ;;  %v269_v12 = vld [vmem:[%s1132_s1 + $0xa8] sm:$0xff] (!%p191_p2)  ;;  %v788_v13 = vpack.c.bf16 (!%p191_p2), %v251_v10, %v250_v9  ;;  %v252_v15 = vld [vmem:[%s1132_s1 + $0x20] sm:$0xff] (!%p191_p2)  ;;  %v270_v17 = vld [vmem:[%s1132_s1 + $0xb0] sm:$0xff] (!%p191_p2) }
   0xa   : > { %785 = vmatpush3.bf16.msra.mxu0 (!%p191_p2), %v784_v7  ;;  %v790_v14 = vpack.c.bf16 (!%p191_p2), %v269_v12, %v268_v11  ;;  %v253_v16 = vld [vmem:[%s1132_s1 + $0x28] sm:$0xff] (!%p191_p2)  ;;  %v271_v18 = vld [vmem:[%s1132_s1 + $0xb8] sm:$0xff] (!%p191_p2)  ;;  %v254_v21 = vld [vmem:[%s1132_s1 + $0x30] sm:$0xff] (!%p191_p2) }
   0xb   : > { %787 = vmatprep.subr.bf16.mxu0 (!%p191_p2), %v786_v8  ;;  %v792_v19 = vpack.c.bf16 (!%p191_p2), %v253_v16, %v252_v15  ;;  %v794_v20 = vpack.c.bf16 (!%p191_p2), %v271_v18, %v270_v17  ;;  %v255_v22 = vld [vmem:[%s1132_s1 + $0x38] sm:$0xff] (!%p191_p2)  ;;  %v272_v23 = vld [vmem:[%s1132_s1 + $0xc0] sm:$0xff] (!%p191_p2)  ;;  %v273_v24 = vld [vmem:[%s1132_s1 + $0xc8] sm:$0xff] (!%p191_p2) }
   0xc   : > { %v796_v26 = vpack.c.bf16 (!%p191_p2), %v255_v22, %v254_v21  ;;  %v798_v27 = vpack.c.bf16 (!%p191_p2), %v273_v24, %v272_v23  ;;  %v256_v28 = vld [vmem:[%s1132_s1 + $0x40] sm:$0xff] (!%p191_p2)  ;;  %v257_v29 = vld [vmem:[%s1132_s1 + $0x48] sm:$0xff] (!%p191_p2)  ;;  %v274_v30 = vld [vmem:[%s1132_s1 + $0xd0] sm:$0xff] (!%p191_p2) }
   0xd   : > { %v275_v31 = vld [vmem:[%s1132_s1 + $0xd8] sm:$0xff] (!%p191_p2)  ;;  %v258_v32 = vld [vmem:[%s1132_s1 + $0x50] sm:$0xff] (!%p191_p2)  ;;  %v800_v33 = vpack.c.bf16 (!%p191_p2), %v257_v29, %v256_v28  ;;  %v400_v34 = vld [vmem:[%s1134_s3] sm:$0xff] (!%p191_p2) }
   0xe   : > { %s1138_s27 = smov (!%p220_p3, %s641_s27), 15  ;;  %789 = vmatpush3.bf16.msra.mxu0 %v788_v13  ;;  %v401_v35 = vld [vmem:[%s1134_s3 + $0x8] sm:$0xff]  ;;  %v402_v36 = vld [vmem:[%s1134_s3 + $0x10] sm:$0xff]  ;;  %v802_v37 = vpack.c.bf16 %v275_v31, %v274_v30  ;;  %v259_v38 = vld [vmem:[%s1132_s1 + $0x58] sm:$0xff] }
   0xf   : > { %s657_s22 = sshll.u32 %s1138_s27, 4  ;;  %791 = vmatprep.subr.bf16.mxu0 %v790_v14  ;;  %v276_v39 = vld [vmem:[%s1132_s1 + $0xe0] sm:$0xff]  ;;  %v814_v40 = vpack.c.bf16 %v401_v35, %v400_v34  ;;  %v403_v41 = vld [vmem:[%s1134_s3 + $0x18] sm:$0xff]  ;;  %v277_v42 = vld [vmem:[%s1132_s1 + $0xe8] sm:$0xff]  ;;  %v804_v46 = vpack.c.bf16 %v259_v38, %v258_v32  ;;  %s645_s6 = sshll.u32 %s1138_s27, 3 }
  0x10   : > { %s983_s29 = scalar_lea.vmem %s1131_s0, %s657_s22  ;;  %v818_v43 = vpack.c.bf16 %v403_v41, %v402_v36  ;;  %v404_v44 = vld [vmem:[%s1134_s3 + $0x20] sm:$0xff]  ;;  %v405_v45 = vld [vmem:[%s1134_s3 + $0x28] sm:$0xff]  ;;  %v806_v47 = vpack.c.bf16 %v277_v42, %v276_v39  ;;  %v278_v50 = vld [vmem:[%s1132_s1 + $0xf0] sm:$0xff]  ;;  %s1110_s9 = scalar_lea.vmem %s1136_s5, %s645_s6 }
  0x11   : > { %v233_v25 = vld [vmem:[%s983_s29 + $0x8] sm:$0xff]  ;;  %815 = vmatprep.subr.bf16.mxu1 %v814_v40  ;;  %v260_v48 = vld [vmem:[%s1132_s1 + $0x60] sm:$0xff]  ;;  %v822_v51 = vpack.c.bf16 %v405_v45, %v404_v44  ;;  %v279_v52 = vld [vmem:[%s1132_s1 + $0xf8] sm:$0xff] }
  0x12   : > { %351 = vmatprep.mubr.f32.mxu0 %v233_v25  ;;  %793 = vmatpush3.bf16.msra.mxu0 %v792_v19  ;;  %v261_v49 = vld [vmem:[%s1132_s1 + $0x68] sm:$0xff]  ;;  %v406_v53 = vld [vmem:[%s1134_s3 + $0x30] sm:$0xff]  ;;  %v407_v54 = vld [vmem:[%s1134_s3 + $0x38] sm:$0xff]  ;;  %v810_v56 = vpack.c.bf16 %v279_v52, %v278_v50 }
  0x13   : > { %795 = vmatprep.subr.bf16.mxu0 %v794_v20  ;;  %817 = vmatpush3.bf16.msra.mxu1 %v814_v40  ;;  %v808_v55 = vpack.c.bf16 %v261_v49, %v260_v48  ;;  %v262_v57 = vld [vmem:[%s1132_s1 + $0x70] sm:$0xff]  ;;  %v263_v58 = vld [vmem:[%s1132_s1 + $0x78] sm:$0xff]  ;;  %v826_v59 = vpack.c.bf16 %v407_v54, %v406_v53  ;;  %v408_v60 = vld [vmem:[%s1134_s3 + $0x40] sm:$0xff] }
  0x14   : > { %819 = vmatprep.subr.bf16.mxu1 %v818_v43  ;;  %v409_v61 = vld [vmem:[%s1134_s3 + $0x48] sm:$0xff]  ;;  %v812_v62 = vpack.c.bf16 %v263_v58, %v262_v57  ;;  %v232_v0 = vld [vmem:[%s983_s29] sm:$0xff]  ;;  %v235_v1 = vld [vmem:[%s983_s29 + $0x18] sm:$0xff] }
  0x15   : > { %v830_v63 = vpack.c.bf16 %v409_v61, %v408_v60  ;;  %v234_v2 = vld [vmem:[%s983_s29 + $0x10] sm:$0xff]  ;;  %v237_v3 = vld [vmem:[%s983_s29 + $0x28] sm:$0xff]  ;;  %v236_v4 = vld [vmem:[%s983_s29 + $0x20] sm:$0xff] }
  0x16   : > { %797 = vmatpush3.bf16.msra.mxu0 %v796_v26  ;;  %v239_v5 = vld [vmem:[%s983_s29 + $0x38] sm:$0xff]  ;;  %v238_v6 = vld [vmem:[%s983_s29 + $0x30] sm:$0xff]  ;;  %v241_v7 = vld [vmem:[%s983_s29 + $0x48] sm:$0xff] }
  0x17   : > { %799 = vmatprep.subr.bf16.mxu0 %v798_v27  ;;  %821 = vmatpush3.bf16.msra.mxu1 %v818_v43  ;;  %v240_v8 = vld [vmem:[%s983_s29 + $0x40] sm:$0xff]  ;;  %v243_v9 = vld [vmem:[%s983_s29 + $0x58] sm:$0xff]  ;;  %v242_v10 = vld [vmem:[%s983_s29 + $0x50] sm:$0xff] }
  0x18   : > { %823 = vmatprep.subr.bf16.mxu1 %v822_v51  ;;  %v245_v11 = vld [vmem:[%s983_s29 + $0x68] sm:$0xff]  ;;  %v244_v12 = vld [vmem:[%s983_s29 + $0x60] sm:$0xff]  ;;  %v247_v13 = vld [vmem:[%s983_s29 + $0x78] sm:$0xff] }
  0x19   : > { %v246_v14 = vld [vmem:[%s983_s29 + $0x70] sm:$0xff]  ;;  %v411_v16 = vld [vmem:[%s1134_s3 + $0x58] sm:$0xff]  ;;  %v412_v18 = vld [vmem:[%s1134_s3 + $0x60] sm:$0xff] }
  0x1a   : > { %801 = vmatpush3.bf16.msra.mxu0 %v800_v33  ;;  %v410_v15 = vld [vmem:[%s1134_s3 + $0x50] sm:$0xff]  ;;  %v413_v19 = vld [vmem:[%s1134_s3 + $0x68] sm:$0xff]  ;;  %v415_v22 = vld [vmem:[%s1134_s3 + $0x78] sm:$0xff] }
  0x1b   : > { %803 = vmatprep.subr.bf16.mxu0 %v802_v37  ;;  %825 = vmatpush3.bf16.msra.mxu1 %v822_v51  ;;  %v834_v17 = vpack.c.bf16 %v411_v16, %v410_v15  ;;  %v838_v20 = vpack.c.bf16 %v413_v19, %v412_v18  ;;  %v414_v21 = vld [vmem:[%s1134_s3 + $0x70] sm:$0xff]  ;;  %v646_v26 = vld [vmem:[%s1133_s2] ss:$0 sm:$0xff] }
  0x1c   : > { %827 = vmatprep.subr.bf16.mxu1 %v826_v59  ;;  %v842_v23 = vpack.c.bf16 %v415_v22, %v414_v21 }
  0x1e   : > { %805 = vmatpush3.bf16.msra.mxu0 %v804_v46 }
  0x1f   : > { %807 = vmatprep.subr.bf16.mxu0 %v806_v47  ;;  %829 = vmatpush3.bf16.msra.mxu1 %v826_v59 }
  0x20   : > { %831 = vmatprep.subr.bf16.mxu1 %v830_v63 }
  0x22   : > { %809 = vmatpush3.bf16.msra.mxu0 %v808_v55 }
  0x23   : > { %811 = vmatprep.subr.bf16.mxu0 %v810_v56  ;;  %833 = vmatpush3.bf16.msra.mxu1 %v830_v63 }
  0x24   : > { %835 = vmatprep.subr.bf16.mxu1 %v834_v17 }
  0x26   : > { %813 = vmatpush3.bf16.msra.mxu0 %v812_v62 }
  0x27   : > { %837 = vmatpush3.bf16.msra.mxu1 %v834_v17 }
  0x28   : > { %839 = vmatprep.subr.bf16.mxu1 %v838_v20 }
  0x29   : > { %352 = vmatmul.mubr.f32.vlgmr.msra.gmra.mrb[0].mxu0 %v232_v0 }
  0x2a   : > { %356 = vmatprep.mubr.f32.mxu0 %v235_v1  ;;  %v417_v1 = vstv %s416_s30 }
  0x2b   : > { %841 = vmatpush3.bf16.msra.mxu1 %v838_v20 }
  0x2c   : > { %843 = vmatprep.subr.bf16.mxu1 %v842_v23 }
  0x2d   : > { %357 = vmatmul.mubr.f32.gmra.mrb[2].mxu0 %v234_v2 }
  0x2e   : > { %361 = vmatprep.mubr.f32.mxu0 %v237_v3 }
  0x2f   : > { %845 = vmatpush3.bf16.msra.mxu1 %v842_v23 }
  0x31   : > { %362 = vmatmul.mubr.f32.gmra.mrb[4].mxu0 %v236_v4 }
  0x32   : > { %366 = vmatprep.mubr.f32.mxu0 %v239_v5 }
  0x35   : > { %367 = vmatmul.mubr.f32.gmra.mrb[6].mxu0 %v238_v6 }
  0x36   : > { %371 = vmatprep.mubr.f32.mxu0 %v241_v7 }
  0x39   : > { %372 = vmatmul.mubr.f32.gmra.mrb[8].mxu0 %v240_v8 }
  0x3a   : > { %376 = vmatprep.mubr.f32.mxu0 %v243_v9 }
  0x3d   : > { %377 = vmatmul.mubr.f32.gmra.mrb[10].mxu0 %v242_v10 }
  0x3e   : > { %381 = vmatprep.mubr.f32.mxu0 %v245_v11 }
  0x41   : > { %382 = vmatmul.mubr.f32.gmra.mrb[12].mxu0 %v244_v12 }
  0x42   : > { %386 = vmatprep.mubr.f32.mxu0 %v247_v13 }
  0x45   : > { %387 = vmatmul.mubr.f32.gmra.mrb[14].mxu0 %v246_v14 }
  0xfc   : > { %v690_v24 = vpop.f32.mrb[0].mxu0 }
  0xfd   : > { %v691_v25 = vpop.f32.mrb[1].mxu0 }
  0xfe   : > { %v692_v27 = vadd.f32 %v691_v25, %v690_v24 }
 0x100   : > { %v693_v28 = vpop.f32.mrb[2].mxu0  ;;  %v354_v29 = vadd.f32 %v692_v27, %v646_v26 }
 0x101   : > { %v694_v30 = vpop.f32.mrb[3].mxu0 }
 0x102   : > { %v695_v31 = vadd.f32 %v694_v30, %v693_v28  ;;  %v392_v32 = vmax.f32 %v354_v29, 0.0 }
 0x104   : > { %v359_v33 = vadd.f32 %v695_v31, %v646_v26  ;;  %v696_v34 = vpop.f32.mrb[4].mxu0  ;;  %770 = vmatprep.mubr.f32.mxu1 %v392_v32 }
 0x105   : > { %v697_v35 = vpop.f32.mrb[5].mxu0 }
 0x106   : > { %v393_v36 = vmax.f32 %v359_v33, 0.0  ;;  %v698_v37 = vadd.f32 %v697_v35, %v696_v34 }
 0x108   : > { %v364_v38 = vadd.f32 %v698_v37, %v646_v26  ;;  %v699_v39 = vpop.f32.mrb[6].mxu0  ;;  %771 = vmatmul.mubr.f32.vlgmr.msra.gmra.mrb[0].mxu1 %v393_v36 }
 0x109   : > { %v700_v40 = vpop.f32.mrb[7].mxu0 }
 0x10a   : > { %v394_v41 = vmax.f32 %v364_v38, 0.0  ;;  %v701_v42 = vadd.f32 %v700_v40, %v699_v39 }
 0x10c   : > { %v369_v43 = vadd.f32 %v701_v42, %v646_v26  ;;  %v702_v44 = vpop.f32.mrb[8].mxu0  ;;  %773 = vmatprep.mubr.f32.mxu1 %v394_v41 }
 0x10d   : > { %v703_v45 = vpop.f32.mrb[9].mxu0 }
 0x10e   : > { %v395_v46 = vmax.f32 %v369_v43, 0.0  ;;  %v704_v47 = vadd.f32 %v703_v45, %v702_v44 }
 0x110   : > { %v374_v48 = vadd.f32 %v704_v47, %v646_v26  ;;  %v705_v49 = vpop.f32.mrb[10].mxu0  ;;  %774 = vmatmul.mubr.f32.gmra.mrb[2].mxu1 %v395_v46 }
 0x111   : > { %v706_v50 = vpop.f32.mrb[11].mxu0 }
 0x112   : > { %v396_v51 = vmax.f32 %v374_v48, 0.0  ;;  %v707_v52 = vadd.f32 %v706_v50, %v705_v49 }
 0x114   : > { %v379_v53 = vadd.f32 %v707_v52, %v646_v26  ;;  %v708_v54 = vpop.f32.mrb[12].mxu0  ;;  %776 = vmatprep.mubr.f32.mxu1 %v396_v51 }
 0x115   : > { %v709_v55 = vpop.f32.mrb[13].mxu0 }
 0x116   : > { %v397_v56 = vmax.f32 %v379_v53, 0.0  ;;  %v710_v57 = vadd.f32 %v709_v55, %v708_v54 }
 0x118   : > { %v384_v58 = vadd.f32 %v710_v57, %v646_v26  ;;  %v711_v59 = vpop.f32.mrb[14].mxu0  ;;  %777 = vmatmul.mubr.f32.gmra.mrb[4].mxu1 %v397_v56 }
 0x119   : > { %v712_v60 = vpop.f32.mrb[15].mxu0 }
 0x11a   : > { %v398_v61 = vmax.f32 %v384_v58, 0.0  ;;  %v713_v62 = vadd.f32 %v712_v60, %v711_v59 }
 0x11c   : > { %v389_v63 = vadd.f32 %v713_v62, %v646_v26  ;;  %779 = vmatprep.mubr.f32.mxu1 %v398_v61 }
 0x11e   : > { %v399_v0 = vmax.f32 %v389_v63, 0.0 }
 0x120   : > { %780 = vmatmul.mubr.f32.gmra.mrb[6].mxu1 %v399_v0 }
 0x1db   : > { %v772_v2 = vpop.f32.mrb[0].mxu1 }
 0x1dc   : > { %v490_v3 = vadd.f32 %v772_v2, %v417_v1  ;;  %v484_v4 = vpop.f32.mrb[1].mxu1 }
 0x1dd   : > { %v485_v5 = vadd.f32 %v484_v4, %v417_v1 }
 0x1de   : > { %v648_v6 = vmul.f32 -1.442695, %v490_v3 }
 0x1df   : > { %v647_v7 = vmul.f32 -1.442695, %v485_v5 }
 0x1e0   : > { %854 = vpow2.f32 %v648_v6 }
 0x1e1   : > { %856 = vpow2.f32 %v647_v7 }
 0x1e3   : > { %v775_v8 = vpop.f32.mrb[2].mxu1 }
 0x1e4   : > { %v500_v9 = vadd.f32 %v775_v8, %v417_v1  ;;  %v494_v10 = vpop.f32.mrb[3].mxu1 }
 0x1e5   : > { %v495_v11 = vadd.f32 %v494_v10, %v417_v1 }
 0x1e6   : > { %v650_v12 = vmul.f32 -1.442695, %v500_v9 }
 0x1e7   : > { %v649_v13 = vmul.f32 -1.442695, %v495_v11 }
 0x1e8   : > { %858 = vpow2.f32 %v650_v12 }
 0x1e9   : > { %860 = vpow2.f32 %v649_v13 }
 0x1ea   : > { %v855_v14 = vpop.eup %854 }
 0x1eb   : > { %v857_v15 = vpop.eup %856  ;;  %v548_v16 = vadd.f32 1.0, %v855_v14  ;;  %v778_v17 = vpop.f32.mrb[4].mxu1 }
 0x1ec   : > { %v547_v18 = vadd.f32 1.0, %v857_v15  ;;  %v510_v19 = vadd.f32 %v778_v17, %v417_v1  ;;  %v504_v20 = vpop.f32.mrb[5].mxu1 }
 0x1ed   : > { %862 = vrcp.f32 %v548_v16  ;;  %v505_v21 = vadd.f32 %v504_v20, %v417_v1 }
 0x1ee   : > { %864 = vrcp.f32 %v547_v18  ;;  %v652_v22 = vmul.f32 -1.442695, %v510_v19 }
 0x1ef   : > { %v651_v23 = vmul.f32 -1.442695, %v505_v21 }
 0x1f0   : > { %866 = vpow2.f32 %v652_v22 }
 0x1f1   : > { %868 = vpow2.f32 %v651_v23 }
 0x1f2   : > { %v859_v24 = vpop.eup %858 }
 0x1f3   : > { %v861_v25 = vpop.eup %860  ;;  %v550_v26 = vadd.f32 1.0, %v859_v24  ;;  %v781_v27 = vpop.f32.mrb[6].mxu1 }
 0x1f4   : > { %v549_v28 = vadd.f32 1.0, %v861_v25  ;;  %v520_v29 = vadd.f32 %v781_v27, %v417_v1  ;;  %v514_v30 = vpop.f32.mrb[7].mxu1 }
 0x1f5   : > { %870 = vrcp.f32 %v550_v26  ;;  %v515_v31 = vadd.f32 %v514_v30, %v417_v1 }
 0x1f6   : > { %872 = vrcp.f32 %v549_v28  ;;  %v654_v32 = vmul.f32 -1.442695, %v520_v29 }
 0x1f7   : > { %v863_v33 = vpop.eup %862  ;;  %v653_v34 = vmul.f32 -1.442695, %v515_v31 }
 0x1f8   : > { %v865_v35 = vpop.eup %864  ;;  %573 = vst.msk [vmem:[%s1110_s9 + $0x8] sm:$0xff] %vm571_vm0, %v863_v33  ;;  %874 = vpow2.f32 %v654_v32 }
 0x1f9   : > { %572 = vst.msk [vmem:[%s1110_s9] sm:$0xff] %vm571_vm0, %v865_v35  ;;  %876 = vpow2.f32 %v653_v34 }
 0x1fa   : > { %v867_v36 = vpop.eup %866 }
 0x1fb   : > { %v869_v37 = vpop.eup %868  ;;  %v552_v38 = vadd.f32 1.0, %v867_v36 }
 0x1fc   : > { %v551_v39 = vadd.f32 1.0, %v869_v37 }
 0x1fd   : > { %878 = vrcp.f32 %v552_v38 }
 0x1fe   : > { %880 = vrcp.f32 %v551_v39 }
 0x1ff   : > { %v871_v40 = vpop.eup %870 }
 0x200   : > { %v873_v41 = vpop.eup %872  ;;  %575 = vst.msk [vmem:[%s1110_s9 + $0x18] sm:$0xff] %vm571_vm0, %v871_v40 }
 0x201   : > { %574 = vst.msk [vmem:[%s1110_s9 + $0x10] sm:$0xff] %vm571_vm0, %v873_v41 }
 0x202   : > { %v875_v42 = vpop.eup %874 }
 0x203   : > { %v877_v43 = vpop.eup %876  ;;  %v554_v44 = vadd.f32 1.0, %v875_v42 }
 0x204   : > { %v553_v45 = vadd.f32 1.0, %v877_v43 }
 0x205   : > { %882 = vrcp.f32 %v554_v44 }
 0x206   : > { %884 = vrcp.f32 %v553_v45 }
 0x207   : > { %v879_v46 = vpop.eup %878 }
 0x208   : > { %v881_v47 = vpop.eup %880  ;;  %577 = vst.msk [vmem:[%s1110_s9 + $0x28] sm:$0xff] %vm571_vm0, %v879_v46 }
 0x209   : > { %576 = vst.msk [vmem:[%s1110_s9 + $0x20] sm:$0xff] %vm571_vm0, %v881_v47 }
 0x20f   : > { %v883_v48 = vpop.eup %882 }
 0x210   : > { %v885_v49 = vpop.eup %884  ;;  %579 = vst.msk [vmem:[%s1110_s9 + $0x38] sm:$0xff] %vm571_vm0, %v883_v48 }
 0x211   : > { %578 = vst.msk [vmem:[%s1110_s9 + $0x30] sm:$0xff] %vm571_vm0, %v885_v49 }
 0x212 PF: > { %s16_s20 = sadd.s32 1, %s892_s20  }
 0x213   : > { %p13_p4 = scmp.ge.s32.totalorder %s16_s20, 4  }
 0x215   :  { %15 = sbr.rel (!%p13_p4) target bundleno = 2 (0x2), region = 70 }

</bundles_post_ra>
